<compile_context>
chip_gen: v7x
topology: tpu7x:2x2x1
jax: 0.10.0
libtpu: 0.0.40
codegen_flags: <defaults>
</compile_context>

<pallas_src>
import jax
import jax.numpy as jnp
from jax.experimental import pallas as pl
from jax.experimental.pallas import tpu as pltpu

EPS = 1e-5
HALO = 2  # max one-sided conv halo (k=5 -> pad 2); uniform for all padded slabs


# --------------------------------- kernel ------------------------------------
def inception_kernel(x_ref, w_ref, p_ref, mask_ref, out_ref,
                     y2pad_ref, y3pad_ref):
    co, nl = out_ref.shape
    cin = x_ref.shape[0]
    c4 = co // 4
    inv_count = 1.0 / float(nl)

    # Column offsets of the six fused conv weights inside the packed slab.
    o_w1 = 0                      # branch1 conv1 (k=1):  (c4, cin)
    o_w21 = o_w1 + cin            # branch2 conv1 (k=1):  (c4, cin)
    o_w23 = o_w21 + cin           # branch2 conv3 (k=3):  (c4, 3*c4)
    o_w31 = o_w23 + 3 * c4        # branch3 conv1 (k=3):  (c4, 3*cin)
    o_w35 = o_w31 + 3 * cin       # branch3 conv5 (k=5):  (c4, 5*c4)
    o_w4 = o_w35 + 5 * c4         # branch4 conv3 (k=3):  (c4, 3*cin)

    def col(i):                   # per-channel param column, single broadcast
        return p_ref[:, i:i + 1]  # (c4, 1)

    def matmul(w, slab):
        return jax.lax.dot_general(w, slab, (((1,), (0,)), ((), ())),
                                   preferred_element_type=jnp.float32)

    def conv(src_ref, k, w_cols, bias_col):
        # src_ref: (C, HALO + N*L + HALO) padded slab.  Tap offset d is a plain
        # window load at lane offset HALO+d; columns whose tap would cross a
        # batch-row boundary are zeroed via the precomputed mask.  All K taps
        # are folded into ONE MXU call batched over the whole batch.
        half = (k - 1) // 2
        taps = []
        for j in range(k):
            d = j - half
            t = src_ref[:, HALO + d:HALO + d + nl]             # (C, N*L)
            if d != 0:
                t = t * mask_ref[HALO + d:HALO + d + 1, :]     # row-edge mask
            taps.append(t)
        slab = taps[0] if k == 1 else jnp.concatenate(taps, axis=0)
        return matmul(w_cols, slab) + bias_col                 # (c4, N*L)

    def to_padded(pad_ref, v):
        # Interior write + halo-only zeroing (no full-buffer clear).
        zeros_halo = jnp.zeros((v.shape[0], HALO), jnp.float32)
        pad_ref[:, 0:HALO] = zeros_halo
        pad_ref[:, HALO + nl:HALO + nl + HALO] = zeros_halo
        pad_ref[:, HALO:HALO + nl] = v

    def bn_relu(y, gamma_col, beta_col):
        # Training-mode BatchNorm (batch stats, biased variance) + ReLU.
        mean = jnp.sum(y, axis=1, keepdims=True) * inv_count
        centered = y - mean
        var = jnp.sum(centered * centered, axis=1, keepdims=True) * inv_count
        scale = gamma_col * jax.lax.rsqrt(var + EPS)           # (c4, 1) hoisted
        return jnp.maximum(centered * scale + beta_col, 0.0)

    # ---- branch1: conv k=1 ---------------------------------------------------
    br1 = conv(x_ref, 1, w_ref[:, o_w1:o_w1 + cin], col(0))

    # ---- branch2: conv k=1 -> BN -> ReLU -> conv k=3 (pad 1) ------------------
    y2 = bn_relu(conv(x_ref, 1, w_ref[:, o_w21:o_w21 + cin], col(1)),
                 col(2), col(3))
    to_padded(y2pad_ref, y2)
    br2 = conv(y2pad_ref, 3, w_ref[:, o_w23:o_w23 + 3 * c4], col(4))

    # ---- branch3: conv k=3 (pad 1) -> BN -> ReLU -> conv k=5 (pad 2) ----------
    y3 = bn_relu(conv(x_ref, 3, w_ref[:, o_w31:o_w31 + 3 * cin], col(5)),
                 col(6), col(7))
    to_padded(y3pad_ref, y3)
    br3 = conv(y3pad_ref, 5, w_ref[:, o_w35:o_w35 + 5 * c4], col(8))

    # ---- branch4: conv k=3 (pad 1) --------------------------------------------
    br4 = conv(x_ref, 3, w_ref[:, o_w4:o_w4 + 3 * cin], col(9))

    # ---- final BatchNorm + ReLU, one 4-channel slice per branch ---------------
    # Per-channel stats of the concatenated tensor == per-slice stats, so the
    # channel concat is never materialized; stores go straight into (Co, N*L).
    out_ref[0 * c4:1 * c4, :] = bn_relu(br1, col(10), col(14))
    out_ref[1 * c4:2 * c4, :] = bn_relu(br2, col(11), col(15))
    out_ref[2 * c4:3 * c4, :] = bn_relu(br3, col(12), col(16))
    out_ref[3 * c4:4 * c4, :] = bn_relu(br4, col(13), col(17))


# --------------------------------- wrapper -----------------------------------
def _fuse_conv_weight(w_oik):
    # PyTorch Conv1d weight (Cout, Cin, K) -> (Cout, K*Cin), tap-major columns.
    o, i, k = w_oik.shape
    return jnp.transpose(w_oik, (0, 2, 1)).reshape(o, k * i)


def inception_forward(x_ncl, params):
    """x_ncl: (N, Cin, L) float32 (PyTorch layout).  Returns (N, Co, L)."""
    n, cin, length = x_ncl.shape
    co = params["bn_g"].shape[0]
    c4 = co // 4
    nl = n * length

    # (N, Cin, L) -> (Cin, N*L) lane-dense, with HALO zero columns on each side
    # so conv taps inside the kernel are plain window loads.
    x_flat = jnp.transpose(x_ncl, (1, 0, 2)).reshape(cin, nl)
    x_pad = jnp.pad(x_flat, ((0, 0), (HALO, HALO)))

    # All six conv weights in one (c4, 8*cin + 8*c4) slab (single input DMA).
    w_packed = jnp.concatenate([
        _fuse_conv_weight(params["b1_w"]),
        _fuse_conv_weight(params["b2_w1"]),
        _fuse_conv_weight(params["b2_w3"]),
        _fuse_conv_weight(params["b3_w1"]),
        _fuse_conv_weight(params["b3_w5"]),
        _fuse_conv_weight(params["b4_w"]),
    ], axis=1)

    # All per-channel vectors in one (c4, 18) slab: 10 branch params, then the
    # final-BN gamma/beta split into their 4 per-branch channel slices.
    p_packed = jnp.concatenate([
        jnp.stack([params["b1_b"], params["b2_b1"], params["b2_g"],
                   params["b2_be"], params["b2_b3"], params["b3_b1"],
                   params["b3_g"], params["b3_be"], params["b3_b5"],
                   params["b4_b"]], axis=1),
        params["bn_g"].reshape(4, c4).T,
        params["bn_be"].reshape(4, c4).T,
    ], axis=1)

    # Row r <-> tap offset d = r - HALO: 1.0 where l + d stays inside the same
    # length-L row, 0.0 where the tap would cross a batch-row boundary.
    l_pos = jnp.tile(jnp.arange(length, dtype=jnp.int32), n)[None, :]   # (1, nl)
    offs = jnp.arange(-HALO, HALO + 1, dtype=jnp.int32)[:, None]        # (2H+1,1)
    tap_mask = ((l_pos + offs >= 0) & (l_pos + offs < length)).astype(jnp.float32)

    out_flat = pl.pallas_call(
        inception_kernel,
        out_shape=jax.ShapeDtypeStruct((co, nl), jnp.float32),
        grid_spec=pltpu.PrefetchScalarGridSpec(
            num_scalar_prefetch=0,
            grid=(1,),   # single step: all four branches in one invocation
            in_specs=[
                pl.BlockSpec((cin, nl + 2 * HALO), lambda i: (0, 0)),
                pl.BlockSpec(w_packed.shape, lambda i: (0, 0)),
                pl.BlockSpec(p_packed.shape, lambda i: (0, 0)),
                pl.BlockSpec((2 * HALO + 1, nl), lambda i: (0, 0)),
            ],
            out_specs=pl.BlockSpec((co, nl), lambda i: (0, 0)),
            scratch_shapes=[
                pltpu.VMEM((c4, nl + 2 * HALO), jnp.float32),   # padded y2
                pltpu.VMEM((c4, nl + 2 * HALO), jnp.float32),   # padded y3
            ],
        ),
        compiler_params=pltpu.CompilerParams(
            dimension_semantics=("arbitrary",),
        ),
    )(x_pad, w_packed, p_packed, tap_mask)

    # (Co, N*L) -> (N, Co, L)
    return jnp.transpose(out_flat.reshape(co, n, length), (1, 0, 2))


# --------------------------- parameter construction --------------------------
def make_params(key, cin, co):
    """Parameters in native PyTorch layout (Conv1d: (Cout, Cin, K); 1-D vecs)."""
    assert co % 4 == 0
    c4 = co // 4

    def uinit(k, shape, fan_in):
        bound = 1.0 / float(fan_in) ** 0.5
        return jax.random.uniform(k, shape, jnp.float32, -bound, bound)

    ks = jax.random.split(key, 12)
    p = {}
    p["b1_w"] = uinit(ks[0], (c4, cin, 1), cin * 1)
    p["b1_b"] = uinit(ks[1], (c4,), cin * 1)
    p["b2_w1"] = uinit(ks[2], (c4, cin, 1), cin * 1)
    p["b2_b1"] = uinit(ks[3], (c4,), cin * 1)
    p["b2_g"] = jnp.ones((c4,), jnp.float32)
    p["b2_be"] = jnp.zeros((c4,), jnp.float32)
    p["b2_w3"] = uinit(ks[4], (c4, c4, 3), c4 * 3)
    p["b2_b3"] = uinit(ks[5], (c4,), c4 * 3)
    p["b3_w1"] = uinit(ks[6], (c4, cin, 3), cin * 3)
    p["b3_b1"] = uinit(ks[7], (c4,), cin * 3)
    p["b3_g"] = jnp.ones((c4,), jnp.float32)
    p["b3_be"] = jnp.zeros((c4,), jnp.float32)
    p["b3_w5"] = uinit(ks[8], (c4, c4, 5), c4 * 5)
    p["b3_b5"] = uinit(ks[9], (c4,), c4 * 5)
    p["b4_w"] = uinit(ks[10], (c4, cin, 3), cin * 3)
    p["b4_b"] = uinit(ks[11], (c4,), cin * 3)
    p["bn_g"] = jnp.ones((co,), jnp.float32)
    p["bn_be"] = jnp.zeros((co,), jnp.float32)
    return p


# ------------------------------ pure-JAX reference ----------------------------
def _conv1d_ref(x_ncl, w_oik, b_o, pad):
    y = jax.lax.conv_general_dilated(
        x_ncl, w_oik, window_strides=(1,), padding=[(pad, pad)],
        dimension_numbers=("NCH", "OIH", "NCH"))
    return y + b_o[None, :, None]


def _bn_relu_ref(y_ncl, g_c, b_c, relu=True):
    mean = jnp.mean(y_ncl, axis=(0, 2), keepdims=True)
    var = jnp.mean((y_ncl - mean) ** 2, axis=(0, 2), keepdims=True)
    out = (y_ncl - mean) * jax.lax.rsqrt(var + EPS) * g_c[None, :, None] \
          + b_c[None, :, None]
    return jnp.maximum(out, 0.0) if relu else out


def inception_reference(x_ncl, p):
    br1 = _conv1d_ref(x_ncl, p["b1_w"], p["b1_b"], 0)
    y2 = _bn_relu_ref(_conv1d_ref(x_ncl, p["b2_w1"], p["b2_b1"], 0),
                      p["b2_g"], p["b2_be"])
    br2 = _conv1d_ref(y2, p["b2_w3"], p["b2_b3"], 1)
    y3 = _bn_relu_ref(_conv1d_ref(x_ncl, p["b3_w1"], p["b3_b1"], 1),
                      p["b3_g"], p["b3_be"])
    br3 = _conv1d_ref(y3, p["b3_w5"], p["b3_b5"], 2)
    br4 = _conv1d_ref(x_ncl, p["b4_w"], p["b4_b"], 1)
    cat = jnp.concatenate([br1, br2, br3, br4], axis=1)
    return _bn_relu_ref(cat, p["bn_g"], p["bn_be"])


# ----------------------------------- main -------------------------------------
if __name__ == "__main__":
    N, CIN, CO, L = 2, 8, 16, 16

    key = jax.random.PRNGKey(0)
    kx, kp = jax.random.split(key)
    x = jax.random.normal(kx, (N, CIN, L), jnp.float32)  # PyTorch NCL layout
    params = make_params(kp, CIN, CO)

    fwd = jax.jit(inception_forward)
    out = jax.block_until_ready(fwd(x, params))
    ref = jax.block_until_ready(inception_reference(x, params))

    assert out.shape == (N, CO, L), out.shape
    max_err = float(jnp.max(jnp.abs(out - ref)))
    assert jnp.allclose(out, ref, atol=2e-3, rtol=2e-3), max_err

    print("KERNEL_OK")
</pallas_src>

<mosaic_0001>
module attributes {stable_mosaic.version = 11 : i64} {
  func.func @inception_kernel(%arg0: i32, %arg1: memref<8x36xf32, #tpu.memory_space<vmem>>, %arg2: memref<4x96xf32, #tpu.memory_space<vmem>>, %arg3: memref<4x18xf32, #tpu.memory_space<vmem>>, %arg4: memref<5x32xf32, #tpu.memory_space<vmem>>, %arg5: memref<16x32xf32, #tpu.memory_space<vmem>>, %arg6: memref<4x36xf32, #tpu.memory_space<vmem>>, %arg7: memref<4x36xf32, #tpu.memory_space<vmem>>) attributes {dimension_semantics = [#tpu.dimension_semantics<arbitrary>], iteration_bounds = array<i64: 1>, scalar_prefetch = 0 : i64, scratch_operands = 2 : i64, tpu.core_type = #tpu.core_type<tc>, window_params = [{pipeline_mode = #tpu.pipeline_mode<synchronous>, transform_indices = @transform_0, window_bounds = array<i64: 8, 36>}, {pipeline_mode = #tpu.pipeline_mode<synchronous>, transform_indices = @transform_1, window_bounds = array<i64: 4, 96>}, {pipeline_mode = #tpu.pipeline_mode<synchronous>, transform_indices = @transform_2, window_bounds = array<i64: 4, 18>}, {pipeline_mode = #tpu.pipeline_mode<synchronous>, transform_indices = @transform_3, window_bounds = array<i64: 5, 32>}, {pipeline_mode = #tpu.pipeline_mode<synchronous>, transform_indices = @transform_4, window_bounds = array<i64: 16, 32>}]} {
    %c0 = arith.constant 0 : index
    %c0_0 = arith.constant 0 : index
    %0 = vector.load %arg2[%c0, %c0_0] : memref<4x96xf32, #tpu.memory_space<vmem>>, vector<4x8xf32>
    %c0_1 = arith.constant 0 : index
    %c0_2 = arith.constant 0 : index
    %1 = vector.load %arg3[%c0_1, %c0_2] : memref<4x18xf32, #tpu.memory_space<vmem>>, vector<4x1xf32>
    %c0_3 = arith.constant 0 : index
    %c2 = arith.constant 2 : index
    %2 = vector.load %arg1[%c0_3, %c2] : memref<8x36xf32, #tpu.memory_space<vmem>>, vector<8x32xf32>
    %cst = arith.constant dense<0.000000e+00> : vector<4x32xf32>
    %3 = tpu.matmul %0, %2, %cst {dimension_numbers = #tpu.dot_dimension_numbers<[1], [0], [0], [1], [0, 0, 1, 1], [], []>} : vector<4x8xf32>, vector<8x32xf32>, vector<4x32xf32> -> vector<4x32xf32>
    %4 = vector.broadcast %1 : vector<4x1xf32> to vector<4x32xf32>
    %5 = arith.addf %3, %4 : vector<4x32xf32>
    %c0_4 = arith.constant 0 : index
    %c8 = arith.constant 8 : index
    %6 = vector.load %arg2[%c0_4, %c8] : memref<4x96xf32, #tpu.memory_space<vmem>>, vector<4x8xf32>
    %c0_5 = arith.constant 0 : index
    %c1 = arith.constant 1 : index
    %7 = vector.load %arg3[%c0_5, %c1] : memref<4x18xf32, #tpu.memory_space<vmem>>, vector<4x1xf32>
    %c0_6 = arith.constant 0 : index
    %c2_7 = arith.constant 2 : index
    %8 = vector.load %arg1[%c0_6, %c2_7] : memref<8x36xf32, #tpu.memory_space<vmem>>, vector<8x32xf32>
    %cst_8 = arith.constant dense<0.000000e+00> : vector<4x32xf32>
    %9 = tpu.matmul %6, %8, %cst_8 {dimension_numbers = #tpu.dot_dimension_numbers<[1], [0], [0], [1], [0, 0, 1, 1], [], []>} : vector<4x8xf32>, vector<8x32xf32>, vector<4x32xf32> -> vector<4x32xf32>
    %10 = vector.broadcast %7 : vector<4x1xf32> to vector<4x32xf32>
    %11 = arith.addf %9, %10 : vector<4x32xf32>
    %c0_9 = arith.constant 0 : index
    %c2_10 = arith.constant 2 : index
    %12 = vector.load %arg3[%c0_9, %c2_10] : memref<4x18xf32, #tpu.memory_space<vmem>>, vector<4x1xf32>
    %c0_11 = arith.constant 0 : index
    %c3 = arith.constant 3 : index
    %13 = vector.load %arg3[%c0_11, %c3] : memref<4x18xf32, #tpu.memory_space<vmem>>, vector<4x1xf32>
    %cst_12 = arith.constant dense<0.000000e+00> : vector<4xf32>
    %14 = vector.multi_reduction <add>, %11, %cst_12 [1] : vector<4x32xf32> to vector<4xf32>
    %15 = vector.shape_cast %14 : vector<4xf32> to vector<4x1xf32>
    %cst_13 = arith.constant 3.125000e-02 : f32
    %16 = vector.broadcast %cst_13 : f32 to vector<4x1xf32>
    %17 = arith.mulf %15, %16 : vector<4x1xf32>
    %18 = vector.broadcast %17 : vector<4x1xf32> to vector<4x32xf32>
    %19 = arith.subf %11, %18 : vector<4x32xf32>
    %20 = arith.mulf %19, %19 : vector<4x32xf32>
    %cst_14 = arith.constant dense<0.000000e+00> : vector<4xf32>
    %21 = vector.multi_reduction <add>, %20, %cst_14 [1] : vector<4x32xf32> to vector<4xf32>
    %22 = vector.shape_cast %21 : vector<4xf32> to vector<4x1xf32>
    %cst_15 = arith.constant 3.125000e-02 : f32
    %23 = vector.broadcast %cst_15 : f32 to vector<4x1xf32>
    %24 = arith.mulf %22, %23 : vector<4x1xf32>
    %cst_16 = arith.constant 9.99999974E-6 : f32
    %25 = vector.broadcast %cst_16 : f32 to vector<4x1xf32>
    %26 = arith.addf %24, %25 : vector<4x1xf32>
    %27 = math.rsqrt %26 : vector<4x1xf32>
    %28 = arith.mulf %12, %27 : vector<4x1xf32>
    %29 = vector.broadcast %28 : vector<4x1xf32> to vector<4x32xf32>
    %30 = arith.mulf %19, %29 : vector<4x32xf32>
    %31 = vector.broadcast %13 : vector<4x1xf32> to vector<4x32xf32>
    %32 = arith.addf %30, %31 : vector<4x32xf32>
    %cst_17 = arith.constant 0.000000e+00 : f32
    %33 = vector.broadcast %cst_17 : f32 to vector<4x32xf32>
    %34 = arith.maximumf %32, %33 : vector<4x32xf32>
    %cst_18 = arith.constant 0.000000e+00 : f32
    %35 = vector.broadcast %cst_18 : f32 to vector<4x2xf32>
    %c0_19 = arith.constant 0 : index
    %c0_20 = arith.constant 0 : index
    %36 = vector.load %arg6[%c0_19, %c0_20] : memref<4x36xf32, #tpu.memory_space<vmem>>, vector<4x2xf32>
    tpu.vector_store %arg6[%c0_19, %c0_20], %35 {strides = array<i32>} : memref<4x36xf32, #tpu.memory_space<vmem>>, vector<4x2xf32>,
    %c0_21 = arith.constant 0 : index
    %c34 = arith.constant 34 : index
    %37 = vector.load %arg6[%c0_21, %c34] : memref<4x36xf32, #tpu.memory_space<vmem>>, vector<4x2xf32>
    tpu.vector_store %arg6[%c0_21, %c34], %35 {strides = array<i32>} : memref<4x36xf32, #tpu.memory_space<vmem>>, vector<4x2xf32>,
    %c0_22 = arith.constant 0 : index
    %c2_23 = arith.constant 2 : index
    %38 = vector.load %arg6[%c0_22, %c2_23] : memref<4x36xf32, #tpu.memory_space<vmem>>, vector<4x32xf32>
    tpu.vector_store %arg6[%c0_22, %c2_23], %34 {strides = array<i32>} : memref<4x36xf32, #tpu.memory_space<vmem>>, vector<4x32xf32>,
    %c0_24 = arith.constant 0 : index
    %c16 = arith.constant 16 : index
    %39 = vector.load %arg2[%c0_24, %c16] : memref<4x96xf32, #tpu.memory_space<vmem>>, vector<4x12xf32>
    %c0_25 = arith.constant 0 : index
    %c4 = arith.constant 4 : index
    %40 = vector.load %arg3[%c0_25, %c4] : memref<4x18xf32, #tpu.memory_space<vmem>>, vector<4x1xf32>
    %c0_26 = arith.constant 0 : index
    %c1_27 = arith.constant 1 : index
    %41 = vector.load %arg6[%c0_26, %c1_27] : memref<4x36xf32, #tpu.memory_space<vmem>>, vector<4x32xf32>
    %c1_28 = arith.constant 1 : index
    %c0_29 = arith.constant 0 : index
    %42 = vector.load %arg4[%c1_28, %c0_29] : memref<5x32xf32, #tpu.memory_space<vmem>>, vector<1x32xf32>
    %43 = vector.broadcast %42 : vector<1x32xf32> to vector<4x32xf32>
    %44 = arith.mulf %41, %43 : vector<4x32xf32>
    %c0_30 = arith.constant 0 : index
    %c2_31 = arith.constant 2 : index
    %45 = vector.load %arg6[%c0_30, %c2_31] : memref<4x36xf32, #tpu.memory_space<vmem>>, vector<4x32xf32>
    %c0_32 = arith.constant 0 : index
    %c3_33 = arith.constant 3 : index
    %46 = vector.load %arg6[%c0_32, %c3_33] : memref<4x36xf32, #tpu.memory_space<vmem>>, vector<4x32xf32>
    %c3_34 = arith.constant 3 : index
    %c0_35 = arith.constant 0 : index
    %47 = vector.load %arg4[%c3_34, %c0_35] : memref<5x32xf32, #tpu.memory_space<vmem>>, vector<1x32xf32>
    %48 = vector.broadcast %47 : vector<1x32xf32> to vector<4x32xf32>
    %49 = arith.mulf %46, %48 : vector<4x32xf32>
    %50 = tpu.concatenate %44, %45, %49 in 0 : vector<4x32xf32>, vector<4x32xf32>, vector<4x32xf32> -> vector<12x32xf32>
    %cst_36 = arith.constant dense<0.000000e+00> : vector<4x32xf32>
    %51 = tpu.matmul %39, %50, %cst_36 {dimension_numbers = #tpu.dot_dimension_numbers<[1], [0], [0], [1], [0, 0, 1, 1], [], []>} : vector<4x12xf32>, vector<12x32xf32>, vector<4x32xf32> -> vector<4x32xf32>
    %52 = vector.broadcast %40 : vector<4x1xf32> to vector<4x32xf32>
    %53 = arith.addf %51, %52 : vector<4x32xf32>
    %c0_37 = arith.constant 0 : index
    %c28 = arith.constant 28 : index
    %54 = vector.load %arg2[%c0_37, %c28] : memref<4x96xf32, #tpu.memory_space<vmem>>, vector<4x24xf32>
    %c0_38 = arith.constant 0 : index
    %c5 = arith.constant 5 : index
    %55 = vector.load %arg3[%c0_38, %c5] : memref<4x18xf32, #tpu.memory_space<vmem>>, vector<4x1xf32>
    %c0_39 = arith.constant 0 : index
    %c1_40 = arith.constant 1 : index
    %56 = vector.load %arg1[%c0_39, %c1_40] : memref<8x36xf32, #tpu.memory_space<vmem>>, vector<8x32xf32>
    %c1_41 = arith.constant 1 : index
    %c0_42 = arith.constant 0 : index
    %57 = vector.load %arg4[%c1_41, %c0_42] : memref<5x32xf32, #tpu.memory_space<vmem>>, vector<1x32xf32>
    %58 = vector.broadcast %57 : vector<1x32xf32> to vector<8x32xf32>
    %59 = arith.mulf %56, %58 : vector<8x32xf32>
    %c0_43 = arith.constant 0 : index
    %c2_44 = arith.constant 2 : index
    %60 = vector.load %arg1[%c0_43, %c2_44] : memref<8x36xf32, #tpu.memory_space<vmem>>, vector<8x32xf32>
    %c0_45 = arith.constant 0 : index
    %c3_46 = arith.constant 3 : index
    %61 = vector.load %arg1[%c0_45, %c3_46] : memref<8x36xf32, #tpu.memory_space<vmem>>, vector<8x32xf32>
    %c3_47 = arith.constant 3 : index
    %c0_48 = arith.constant 0 : index
    %62 = vector.load %arg4[%c3_47, %c0_48] : memref<5x32xf32, #tpu.memory_space<vmem>>, vector<1x32xf32>
    %63 = vector.broadcast %62 : vector<1x32xf32> to vector<8x32xf32>
    %64 = arith.mulf %61, %63 : vector<8x32xf32>
    %65 = tpu.concatenate %59, %60, %64 in 0 : vector<8x32xf32>, vector<8x32xf32>, vector<8x32xf32> -> vector<24x32xf32>
    %cst_49 = arith.constant dense<0.000000e+00> : vector<4x32xf32>
    %66 = tpu.matmul %54, %65, %cst_49 {dimension_numbers = #tpu.dot_dimension_numbers<[1], [0], [0], [1], [0, 0, 1, 1], [], []>} : vector<4x24xf32>, vector<24x32xf32>, vector<4x32xf32> -> vector<4x32xf32>
    %67 = vector.broadcast %55 : vector<4x1xf32> to vector<4x32xf32>
    %68 = arith.addf %66, %67 : vector<4x32xf32>
    %c0_50 = arith.constant 0 : index
    %c6 = arith.constant 6 : index
    %69 = vector.load %arg3[%c0_50, %c6] : memref<4x18xf32, #tpu.memory_space<vmem>>, vector<4x1xf32>
    %c0_51 = arith.constant 0 : index
    %c7 = arith.constant 7 : index
    %70 = vector.load %arg3[%c0_51, %c7] : memref<4x18xf32, #tpu.memory_space<vmem>>, vector<4x1xf32>
    %cst_52 = arith.constant dense<0.000000e+00> : vector<4xf32>
    %71 = vector.multi_reduction <add>, %68, %cst_52 [1] : vector<4x32xf32> to vector<4xf32>
    %72 = vector.shape_cast %71 : vector<4xf32> to vector<4x1xf32>
    %cst_53 = arith.constant 3.125000e-02 : f32
    %73 = vector.broadcast %cst_53 : f32 to vector<4x1xf32>
    %74 = arith.mulf %72, %73 : vector<4x1xf32>
    %75 = vector.broadcast %74 : vector<4x1xf32> to vector<4x32xf32>
    %76 = arith.subf %68, %75 : vector<4x32xf32>
    %77 = arith.mulf %76, %76 : vector<4x32xf32>
    %cst_54 = arith.constant dense<0.000000e+00> : vector<4xf32>
    %78 = vector.multi_reduction <add>, %77, %cst_54 [1] : vector<4x32xf32> to vector<4xf32>
    %79 = vector.shape_cast %78 : vector<4xf32> to vector<4x1xf32>
    %cst_55 = arith.constant 3.125000e-02 : f32
    %80 = vector.broadcast %cst_55 : f32 to vector<4x1xf32>
    %81 = arith.mulf %79, %80 : vector<4x1xf32>
    %cst_56 = arith.constant 9.99999974E-6 : f32
    %82 = vector.broadcast %cst_56 : f32 to vector<4x1xf32>
    %83 = arith.addf %81, %82 : vector<4x1xf32>
    %84 = math.rsqrt %83 : vector<4x1xf32>
    %85 = arith.mulf %69, %84 : vector<4x1xf32>
    %86 = vector.broadcast %85 : vector<4x1xf32> to vector<4x32xf32>
    %87 = arith.mulf %76, %86 : vector<4x32xf32>
    %88 = vector.broadcast %70 : vector<4x1xf32> to vector<4x32xf32>
    %89 = arith.addf %87, %88 : vector<4x32xf32>
    %cst_57 = arith.constant 0.000000e+00 : f32
    %90 = vector.broadcast %cst_57 : f32 to vector<4x32xf32>
    %91 = arith.maximumf %89, %90 : vector<4x32xf32>
    %cst_58 = arith.constant 0.000000e+00 : f32
    %92 = vector.broadcast %cst_58 : f32 to vector<4x2xf32>
    %c0_59 = arith.constant 0 : index
    %c0_60 = arith.constant 0 : index
    %93 = vector.load %arg7[%c0_59, %c0_60] : memref<4x36xf32, #tpu.memory_space<vmem>>, vector<4x2xf32>
    tpu.vector_store %arg7[%c0_59, %c0_60], %92 {strides = array<i32>} : memref<4x36xf32, #tpu.memory_space<vmem>>, vector<4x2xf32>,
    %c0_61 = arith.constant 0 : index
    %c34_62 = arith.constant 34 : index
    %94 = vector.load %arg7[%c0_61, %c34_62] : memref<4x36xf32, #tpu.memory_space<vmem>>, vector<4x2xf32>
    tpu.vector_store %arg7[%c0_61, %c34_62], %92 {strides = array<i32>} : memref<4x36xf32, #tpu.memory_space<vmem>>, vector<4x2xf32>,
    %c0_63 = arith.constant 0 : index
    %c2_64 = arith.constant 2 : index
    %95 = vector.load %arg7[%c0_63, %c2_64] : memref<4x36xf32, #tpu.memory_space<vmem>>, vector<4x32xf32>
    tpu.vector_store %arg7[%c0_63, %c2_64], %91 {strides = array<i32>} : memref<4x36xf32, #tpu.memory_space<vmem>>, vector<4x32xf32>,
    %c0_65 = arith.constant 0 : index
    %c52 = arith.constant 52 : index
    %96 = vector.load %arg2[%c0_65, %c52] : memref<4x96xf32, #tpu.memory_space<vmem>>, vector<4x20xf32>
    %c0_66 = arith.constant 0 : index
    %c8_67 = arith.constant 8 : index
    %97 = vector.load %arg3[%c0_66, %c8_67] : memref<4x18xf32, #tpu.memory_space<vmem>>, vector<4x1xf32>
    %c0_68 = arith.constant 0 : index
    %c0_69 = arith.constant 0 : index
    %98 = vector.load %arg7[%c0_68, %c0_69] : memref<4x36xf32, #tpu.memory_space<vmem>>, vector<4x32xf32>
    %c0_70 = arith.constant 0 : index
    %c0_71 = arith.constant 0 : index
    %99 = vector.load %arg4[%c0_70, %c0_71] : memref<5x32xf32, #tpu.memory_space<vmem>>, vector<1x32xf32>
    %100 = vector.broadcast %99 : vector<1x32xf32> to vector<4x32xf32>
    %101 = arith.mulf %98, %100 : vector<4x32xf32>
    %c0_72 = arith.constant 0 : index
    %c1_73 = arith.constant 1 : index
    %102 = vector.load %arg7[%c0_72, %c1_73] : memref<4x36xf32, #tpu.memory_space<vmem>>, vector<4x32xf32>
    %c1_74 = arith.constant 1 : index
    %c0_75 = arith.constant 0 : index
    %103 = vector.load %arg4[%c1_74, %c0_75] : memref<5x32xf32, #tpu.memory_space<vmem>>, vector<1x32xf32>
    %104 = vector.broadcast %103 : vector<1x32xf32> to vector<4x32xf32>
    %105 = arith.mulf %102, %104 : vector<4x32xf32>
    %c0_76 = arith.constant 0 : index
    %c2_77 = arith.constant 2 : index
    %106 = vector.load %arg7[%c0_76, %c2_77] : memref<4x36xf32, #tpu.memory_space<vmem>>, vector<4x32xf32>
    %c0_78 = arith.constant 0 : index
    %c3_79 = arith.constant 3 : index
    %107 = vector.load %arg7[%c0_78, %c3_79] : memref<4x36xf32, #tpu.memory_space<vmem>>, vector<4x32xf32>
    %c3_80 = arith.constant 3 : index
    %c0_81 = arith.constant 0 : index
    %108 = vector.load %arg4[%c3_80, %c0_81] : memref<5x32xf32, #tpu.memory_space<vmem>>, vector<1x32xf32>
    %109 = vector.broadcast %108 : vector<1x32xf32> to vector<4x32xf32>
    %110 = arith.mulf %107, %109 : vector<4x32xf32>
    %c0_82 = arith.constant 0 : index
    %c4_83 = arith.constant 4 : index
    %111 = vector.load %arg7[%c0_82, %c4_83] : memref<4x36xf32, #tpu.memory_space<vmem>>, vector<4x32xf32>
    %c4_84 = arith.constant 4 : index
    %c0_85 = arith.constant 0 : index
    %112 = vector.load %arg4[%c4_84, %c0_85] : memref<5x32xf32, #tpu.memory_space<vmem>>, vector<1x32xf32>
    %113 = vector.broadcast %112 : vector<1x32xf32> to vector<4x32xf32>
    %114 = arith.mulf %111, %113 : vector<4x32xf32>
    %115 = tpu.concatenate %101, %105, %106, %110, %114 in 0 : vector<4x32xf32>, vector<4x32xf32>, vector<4x32xf32>, vector<4x32xf32>, vector<4x32xf32> -> vector<20x32xf32>
    %cst_86 = arith.constant dense<0.000000e+00> : vector<4x32xf32>
    %116 = tpu.matmul %96, %115, %cst_86 {dimension_numbers = #tpu.dot_dimension_numbers<[1], [0], [0], [1], [0, 0, 1, 1], [], []>} : vector<4x20xf32>, vector<20x32xf32>, vector<4x32xf32> -> vector<4x32xf32>
    %117 = vector.broadcast %97 : vector<4x1xf32> to vector<4x32xf32>
    %118 = arith.addf %116, %117 : vector<4x32xf32>
    %c0_87 = arith.constant 0 : index
    %c72 = arith.constant 72 : index
    %119 = vector.load %arg2[%c0_87, %c72] : memref<4x96xf32, #tpu.memory_space<vmem>>, vector<4x24xf32>
    %c0_88 = arith.constant 0 : index
    %c9 = arith.constant 9 : index
    %120 = vector.load %arg3[%c0_88, %c9] : memref<4x18xf32, #tpu.memory_space<vmem>>, vector<4x1xf32>
    %c0_89 = arith.constant 0 : index
    %c1_90 = arith.constant 1 : index
    %121 = vector.load %arg1[%c0_89, %c1_90] : memref<8x36xf32, #tpu.memory_space<vmem>>, vector<8x32xf32>
    %c1_91 = arith.constant 1 : index
    %c0_92 = arith.constant 0 : index
    %122 = vector.load %arg4[%c1_91, %c0_92] : memref<5x32xf32, #tpu.memory_space<vmem>>, vector<1x32xf32>
    %123 = vector.broadcast %122 : vector<1x32xf32> to vector<8x32xf32>
    %124 = arith.mulf %121, %123 : vector<8x32xf32>
    %c0_93 = arith.constant 0 : index
    %c2_94 = arith.constant 2 : index
    %125 = vector.load %arg1[%c0_93, %c2_94] : memref<8x36xf32, #tpu.memory_space<vmem>>, vector<8x32xf32>
    %c0_95 = arith.constant 0 : index
    %c3_96 = arith.constant 3 : index
    %126 = vector.load %arg1[%c0_95, %c3_96] : memref<8x36xf32, #tpu.memory_space<vmem>>, vector<8x32xf32>
    %c3_97 = arith.constant 3 : index
    %c0_98 = arith.constant 0 : index
    %127 = vector.load %arg4[%c3_97, %c0_98] : memref<5x32xf32, #tpu.memory_space<vmem>>, vector<1x32xf32>
    %128 = vector.broadcast %127 : vector<1x32xf32> to vector<8x32xf32>
    %129 = arith.mulf %126, %128 : vector<8x32xf32>
    %130 = tpu.concatenate %124, %125, %129 in 0 : vector<8x32xf32>, vector<8x32xf32>, vector<8x32xf32> -> vector<24x32xf32>
    %cst_99 = arith.constant dense<0.000000e+00> : vector<4x32xf32>
    %131 = tpu.matmul %119, %130, %cst_99 {dimension_numbers = #tpu.dot_dimension_numbers<[1], [0], [0], [1], [0, 0, 1, 1], [], []>} : vector<4x24xf32>, vector<24x32xf32>, vector<4x32xf32> -> vector<4x32xf32>
    %132 = vector.broadcast %120 : vector<4x1xf32> to vector<4x32xf32>
    %133 = arith.addf %131, %132 : vector<4x32xf32>
    %c0_100 = arith.constant 0 : index
    %c10 = arith.constant 10 : index
    %134 = vector.load %arg3[%c0_100, %c10] : memref<4x18xf32, #tpu.memory_space<vmem>>, vector<4x1xf32>
    %c0_101 = arith.constant 0 : index
    %c14 = arith.constant 14 : index
    %135 = vector.load %arg3[%c0_101, %c14] : memref<4x18xf32, #tpu.memory_space<vmem>>, vector<4x1xf32>
    %cst_102 = arith.constant dense<0.000000e+00> : vector<4xf32>
    %136 = vector.multi_reduction <add>, %5, %cst_102 [1] : vector<4x32xf32> to vector<4xf32>
    %137 = vector.shape_cast %136 : vector<4xf32> to vector<4x1xf32>
    %cst_103 = arith.constant 3.125000e-02 : f32
    %138 = vector.broadcast %cst_103 : f32 to vector<4x1xf32>
    %139 = arith.mulf %137, %138 : vector<4x1xf32>
    %140 = vector.broadcast %139 : vector<4x1xf32> to vector<4x32xf32>
    %141 = arith.subf %5, %140 : vector<4x32xf32>
    %142 = arith.mulf %141, %141 : vector<4x32xf32>
    %cst_104 = arith.constant dense<0.000000e+00> : vector<4xf32>
    %143 = vector.multi_reduction <add>, %142, %cst_104 [1] : vector<4x32xf32> to vector<4xf32>
    %144 = vector.shape_cast %143 : vector<4xf32> to vector<4x1xf32>
    %cst_105 = arith.constant 3.125000e-02 : f32
    %145 = vector.broadcast %cst_105 : f32 to vector<4x1xf32>
    %146 = arith.mulf %144, %145 : vector<4x1xf32>
    %cst_106 = arith.constant 9.99999974E-6 : f32
    %147 = vector.broadcast %cst_106 : f32 to vector<4x1xf32>
    %148 = arith.addf %146, %147 : vector<4x1xf32>
    %149 = math.rsqrt %148 : vector<4x1xf32>
    %150 = arith.mulf %134, %149 : vector<4x1xf32>
    %151 = vector.broadcast %150 : vector<4x1xf32> to vector<4x32xf32>
    %152 = arith.mulf %141, %151 : vector<4x32xf32>
    %153 = vector.broadcast %135 : vector<4x1xf32> to vector<4x32xf32>
    %154 = arith.addf %152, %153 : vector<4x32xf32>
    %cst_107 = arith.constant 0.000000e+00 : f32
    %155 = vector.broadcast %cst_107 : f32 to vector<4x32xf32>
    %156 = arith.maximumf %154, %155 : vector<4x32xf32>
    %c0_108 = arith.constant 0 : index
    %c0_109 = arith.constant 0 : index
    %157 = vector.load %arg5[%c0_108, %c0_109] : memref<16x32xf32, #tpu.memory_space<vmem>>, vector<4x32xf32>
    tpu.vector_store %arg5[%c0_108, %c0_109], %156 {strides = array<i32>} : memref<16x32xf32, #tpu.memory_space<vmem>>, vector<4x32xf32>,
    %c0_110 = arith.constant 0 : index
    %c11 = arith.constant 11 : index
    %158 = vector.load %arg3[%c0_110, %c11] : memref<4x18xf32, #tpu.memory_space<vmem>>, vector<4x1xf32>
    %c0_111 = arith.constant 0 : index
    %c15 = arith.constant 15 : index
    %159 = vector.load %arg3[%c0_111, %c15] : memref<4x18xf32, #tpu.memory_space<vmem>>, vector<4x1xf32>
    %cst_112 = arith.constant dense<0.000000e+00> : vector<4xf32>
    %160 = vector.multi_reduction <add>, %53, %cst_112 [1] : vector<4x32xf32> to vector<4xf32>
    %161 = vector.shape_cast %160 : vector<4xf32> to vector<4x1xf32>
    %cst_113 = arith.constant 3.125000e-02 : f32
    %162 = vector.broadcast %cst_113 : f32 to vector<4x1xf32>
    %163 = arith.mulf %161, %162 : vector<4x1xf32>
    %164 = vector.broadcast %163 : vector<4x1xf32> to vector<4x32xf32>
    %165 = arith.subf %53, %164 : vector<4x32xf32>
    %166 = arith.mulf %165, %165 : vector<4x32xf32>
    %cst_114 = arith.constant dense<0.000000e+00> : vector<4xf32>
    %167 = vector.multi_reduction <add>, %166, %cst_114 [1] : vector<4x32xf32> to vector<4xf32>
    %168 = vector.shape_cast %167 : vector<4xf32> to vector<4x1xf32>
    %cst_115 = arith.constant 3.125000e-02 : f32
    %169 = vector.broadcast %cst_115 : f32 to vector<4x1xf32>
    %170 = arith.mulf %168, %169 : vector<4x1xf32>
    %cst_116 = arith.constant 9.99999974E-6 : f32
    %171 = vector.broadcast %cst_116 : f32 to vector<4x1xf32>
    %172 = arith.addf %170, %171 : vector<4x1xf32>
    %173 = math.rsqrt %172 : vector<4x1xf32>
    %174 = arith.mulf %158, %173 : vector<4x1xf32>
    %175 = vector.broadcast %174 : vector<4x1xf32> to vector<4x32xf32>
    %176 = arith.mulf %165, %175 : vector<4x32xf32>
    %177 = vector.broadcast %159 : vector<4x1xf32> to vector<4x32xf32>
    %178 = arith.addf %176, %177 : vector<4x32xf32>
    %cst_117 = arith.constant 0.000000e+00 : f32
    %179 = vector.broadcast %cst_117 : f32 to vector<4x32xf32>
    %180 = arith.maximumf %178, %179 : vector<4x32xf32>
    %c4_118 = arith.constant 4 : index
    %c0_119 = arith.constant 0 : index
    %181 = vector.load %arg5[%c4_118, %c0_119] : memref<16x32xf32, #tpu.memory_space<vmem>>, vector<4x32xf32>
    tpu.vector_store %arg5[%c4_118, %c0_119], %180 {strides = array<i32>} : memref<16x32xf32, #tpu.memory_space<vmem>>, vector<4x32xf32>,
    %c0_120 = arith.constant 0 : index
    %c12 = arith.constant 12 : index
    %182 = vector.load %arg3[%c0_120, %c12] : memref<4x18xf32, #tpu.memory_space<vmem>>, vector<4x1xf32>
    %c0_121 = arith.constant 0 : index
    %c16_122 = arith.constant 16 : index
    %183 = vector.load %arg3[%c0_121, %c16_122] : memref<4x18xf32, #tpu.memory_space<vmem>>, vector<4x1xf32>
    %cst_123 = arith.constant dense<0.000000e+00> : vector<4xf32>
    %184 = vector.multi_reduction <add>, %118, %cst_123 [1] : vector<4x32xf32> to vector<4xf32>
    %185 = vector.shape_cast %184 : vector<4xf32> to vector<4x1xf32>
    %cst_124 = arith.constant 3.125000e-02 : f32
    %186 = vector.broadcast %cst_124 : f32 to vector<4x1xf32>
    %187 = arith.mulf %185, %186 : vector<4x1xf32>
    %188 = vector.broadcast %187 : vector<4x1xf32> to vector<4x32xf32>
    %189 = arith.subf %118, %188 : vector<4x32xf32>
    %190 = arith.mulf %189, %189 : vector<4x32xf32>
    %cst_125 = arith.constant dense<0.000000e+00> : vector<4xf32>
    %191 = vector.multi_reduction <add>, %190, %cst_125 [1] : vector<4x32xf32> to vector<4xf32>
    %192 = vector.shape_cast %191 : vector<4xf32> to vector<4x1xf32>
    %cst_126 = arith.constant 3.125000e-02 : f32
    %193 = vector.broadcast %cst_126 : f32 to vector<4x1xf32>
    %194 = arith.mulf %192, %193 : vector<4x1xf32>
    %cst_127 = arith.constant 9.99999974E-6 : f32
    %195 = vector.broadcast %cst_127 : f32 to vector<4x1xf32>
    %196 = arith.addf %194, %195 : vector<4x1xf32>
    %197 = math.rsqrt %196 : vector<4x1xf32>
    %198 = arith.mulf %182, %197 : vector<4x1xf32>
    %199 = vector.broadcast %198 : vector<4x1xf32> to vector<4x32xf32>
    %200 = arith.mulf %189, %199 : vector<4x32xf32>
    %201 = vector.broadcast %183 : vector<4x1xf32> to vector<4x32xf32>
    %202 = arith.addf %200, %201 : vector<4x32xf32>
    %cst_128 = arith.constant 0.000000e+00 : f32
    %203 = vector.broadcast %cst_128 : f32 to vector<4x32xf32>
    %204 = arith.maximumf %202, %203 : vector<4x32xf32>
    %c8_129 = arith.constant 8 : index
    %c0_130 = arith.constant 0 : index
    %205 = vector.load %arg5[%c8_129, %c0_130] : memref<16x32xf32, #tpu.memory_space<vmem>>, vector<4x32xf32>
    tpu.vector_store %arg5[%c8_129, %c0_130], %204 {strides = array<i32>} : memref<16x32xf32, #tpu.memory_space<vmem>>, vector<4x32xf32>,
    %c0_131 = arith.constant 0 : index
    %c13 = arith.constant 13 : index
    %206 = vector.load %arg3[%c0_131, %c13] : memref<4x18xf32, #tpu.memory_space<vmem>>, vector<4x1xf32>
    %c0_132 = arith.constant 0 : index
    %c17 = arith.constant 17 : index
    %207 = vector.load %arg3[%c0_132, %c17] : memref<4x18xf32, #tpu.memory_space<vmem>>, vector<4x1xf32>
    %cst_133 = arith.constant dense<0.000000e+00> : vector<4xf32>
    %208 = vector.multi_reduction <add>, %133, %cst_133 [1] : vector<4x32xf32> to vector<4xf32>
    %209 = vector.shape_cast %208 : vector<4xf32> to vector<4x1xf32>
    %cst_134 = arith.constant 3.125000e-02 : f32
    %210 = vector.broadcast %cst_134 : f32 to vector<4x1xf32>
    %211 = arith.mulf %209, %210 : vector<4x1xf32>
    %212 = vector.broadcast %211 : vector<4x1xf32> to vector<4x32xf32>
    %213 = arith.subf %133, %212 : vector<4x32xf32>
    %214 = arith.mulf %213, %213 : vector<4x32xf32>
    %cst_135 = arith.constant dense<0.000000e+00> : vector<4xf32>
    %215 = vector.multi_reduction <add>, %214, %cst_135 [1] : vector<4x32xf32> to vector<4xf32>
    %216 = vector.shape_cast %215 : vector<4xf32> to vector<4x1xf32>
    %cst_136 = arith.constant 3.125000e-02 : f32
    %217 = vector.broadcast %cst_136 : f32 to vector<4x1xf32>
    %218 = arith.mulf %216, %217 : vector<4x1xf32>
    %cst_137 = arith.constant 9.99999974E-6 : f32
    %219 = vector.broadcast %cst_137 : f32 to vector<4x1xf32>
    %220 = arith.addf %218, %219 : vector<4x1xf32>
    %221 = math.rsqrt %220 : vector<4x1xf32>
    %222 = arith.mulf %206, %221 : vector<4x1xf32>
    %223 = vector.broadcast %222 : vector<4x1xf32> to vector<4x32xf32>
    %224 = arith.mulf %213, %223 : vector<4x32xf32>
    %225 = vector.broadcast %207 : vector<4x1xf32> to vector<4x32xf32>
    %226 = arith.addf %224, %225 : vector<4x32xf32>
    %cst_138 = arith.constant 0.000000e+00 : f32
    %227 = vector.broadcast %cst_138 : f32 to vector<4x32xf32>
    %228 = arith.maximumf %226, %227 : vector<4x32xf32>
    %c12_139 = arith.constant 12 : index
    %c0_140 = arith.constant 0 : index
    %229 = vector.load %arg5[%c12_139, %c0_140] : memref<16x32xf32, #tpu.memory_space<vmem>>, vector<4x32xf32>
    tpu.vector_store %arg5[%c12_139, %c0_140], %228 {strides = array<i32>} : memref<16x32xf32, #tpu.memory_space<vmem>>, vector<4x32xf32>,
    return
  }
  func.func @transform_0(%arg0: i32) -> (i32, i32) {
    %c0_i32 = arith.constant 0 : i32
    %c0_i32_0 = arith.constant 0 : i32
    %c0_i32_1 = arith.constant 0 : i32
    return %c0_i32, %c0_i32_0 : i32, i32
  }
  func.func @transform_1(%arg0: i32) -> (i32, i32) {
    %c0_i32 = arith.constant 0 : i32
    %c0_i32_0 = arith.constant 0 : i32
    %c0_i32_1 = arith.constant 0 : i32
    return %c0_i32, %c0_i32_0 : i32, i32
  }
  func.func @transform_2(%arg0: i32) -> (i32, i32) {
    %c0_i32 = arith.constant 0 : i32
    %c0_i32_0 = arith.constant 0 : i32
    %c0_i32_1 = arith.constant 0 : i32
    return %c0_i32, %c0_i32_0 : i32, i32
  }
  func.func @transform_3(%arg0: i32) -> (i32, i32) {
    %c0_i32 = arith.constant 0 : i32
    %c0_i32_0 = arith.constant 0 : i32
    %c0_i32_1 = arith.constant 0 : i32
    return %c0_i32, %c0_i32_0 : i32, i32
  }
  func.func @transform_4(%arg0: i32) -> (i32, i32) {
    %c0_i32 = arith.constant 0 : i32
    %c0_i32_0 = arith.constant 0 : i32
    %c0_i32_1 = arith.constant 0 : i32
    return %c0_i32, %c0_i32_0 : i32, i32
  }
}

</mosaic_0001>

<bundles_post_ra>
// kernel: inception_forward.1
= control target key start
LH: loop header
LB: loop body
LE: loop exit
PB: predicated region body
PF: predicated region fallthrough
CT: control target
= control target key end

     0   :  { %v992_v2 = vmov 0.0   ;;  %vm993_vm0 = vmmov 0   ;;  %s994_s19 = smov 3   ;;  %s995_s20 = smov 127   ;;  %v999_v5 = vmov 1   ;;  %vm29_vm1 = vcmask 64512   ;;  %s1244_s3 = inlined_call_operand.vmem [shape: f32[5,32], index: 3, kind: input, shape index: {}]   ;;  %s1245_s0 = inlined_call_operand.vmem [shape: f32[8,36], index: 0, kind: input, shape index: {}]   ;;  %s1246_s1 = inlined_call_operand.vmem [shape: f32[4,96], index: 1, kind: input, shape index: {}]   ;;  %s1247_s2 = inlined_call_operand.vmem [shape: f32[4,18], index: 2, kind: input, shape index: {}]   ;;  %s1248_s4 = inlined_call_operand.vmem [shape: f32[16,32], index: 4, kind: output, shape index: {}]  }
   0x1   :  { %v1055_v0 = vld [vmem:[%s1244_s3 + $0x3] ss:$0 sm:$0xff]  ;;  %859 = vmatprep.subr.mxu1 %v992_v2  ;;  %861 = vmatprep.mubr.msk.f32.mxu1 %vm993_vm0, %v992_v2  ;;  %v1072_v3 = vld [vmem:[%s1244_s3 + $0x1] ss:$0 sm:$0xff]  ;;  %s997_s23 = smov 126   ;;  %s998_s26 = smov 120  }
   0x2   :  { %v1060_v1 = vld [vmem:[%s1245_s0] sm:$0xff]  ;;  %236 = vrot.lane.b32.xlu0 %v1055_v0, %s994_s19  ;;  %854 = vmatprep.subr.mxu0 %v992_v2  ;;  %s996_s0 = smov 1   ;;  %v1000_v12 = vmov 0.0|0.0   ;;  %s1001_s29 = smov 100   ;;  %v1002_v23 = vmov 5   ;;  %vm364_vm2 = vcmask 195584  }
   0x3   :  { %343 = vrot.lane.b32.xlu1 %v1060_v1, %s995_s20  ;;  %856 = vmatprep.mubr.msk.f32.mxu0 %vm993_vm0, %v992_v2  ;;  %v17_v4 = vld [vmem:[%s1246_s1] sm:$0xf]  ;;  %vm181_vm3 = vcmask 257024   ;;  %v1003_v36 = vmov 2   ;;  %v1004_v42 = vmov 3   ;;  %v1005_v53 = vmov 6  }
   0x4   :  { %951 = vset.pattern.permute.xlu1 %v999_v5  ;;  %v1101_v15 = vld [vmem:[%s1246_s1] sm:$0xf]  ;;  %952 = vset.pattern.permute.xlu0 %v1002_v23  ;;  %v1006_v63 = vmov 7   ;;  %vm207_vm4 = vcmask 11264   ;;  %vm209_vm5 = vcmask 290064   ;;  %s1007_s8 = smov 2  }
   0x5   :  { %v1110_v17 = vld [vmem:[%s1247_s2] sm:$0xf]  ;;  %208 = vst.msk [vmem:[#allocation2] sm:$0xf] %vm207_vm4, %v992_v2  ;;  %462 = vst.msk [vmem:[#allocation3] sm:$0xf] %vm207_vm4, %v992_v2 }
   0x6   :  { %226 = vrot.lane.b32.xlu0 %v1072_v3, %s996_s0  ;;  %v1116_v21 = vld [vmem:[%s1247_s2] sm:$0xf]  ;;  %210 = vst.msk [vmem:[#allocation2] sm:$0xf] %vm209_vm5, %v992_v2  ;;  %463 = vst.msk [vmem:[#allocation3] sm:$0xf] %vm209_vm5, %v992_v2 }
   0x7   :  { %26 = vrot.lane.b32.xlu1 %v1060_v1, %s997_s23  ;;  %vm215_vm6 = vcmask 273424   ;;  %s1008_s9 = smov 112   ;;  %s1010_s12 = smov 4   ;;  %vm248_vm7 = vcmask 1043456   ;;  %vm1018_vm8 = vmmov 1   ;;  %vm264_vm10 = vcmask 97280  }
   0x8   :  { %s1012_s13 = smov 125   ;;  %s1013_s14 = smov 124   ;;  %vm900_vm9 = vmpackc.low %vm248_vm7, %vm1018_vm8  ;;  %vm535_vm11 = vcmask 162816  }
   0x9   :  { %s1014_s17 = smov 76   ;;  %s1015_s18 = smov 56  }
   0xa   :  { %107 = vrot.lane.b32.xlu0 %v17_v4, %s998_s26 }
  0x74   :  { %v1084_v6 = vpop.permute.xlu0 %236 }
  0x75   :  { %v344_v7 = vpop.permute.xlu1 %343  ;;  %v341_v8 = vmul.f32 %v1060_v1, %v1084_v6 }
  0x77   :  { %346 = vrot.lane.b32.xlu1 %v341_v8, %s997_s23 }
  0x78   :  { %v1089_v9 = vpop.permute.xlu0 %226 }
  0x79   :  { %v27_v10 = vpop.permute.xlu1 %26  ;;  %v340_v11 = vmul.f32 %v1060_v1, %v1089_v9 }
  0x7a   :  { %860 = vmatpush3.msra.mxu1 %v27_v10  ;;  %855 = vmatpush3.msra.mxu0 %v27_v10 }
  0x7b   :  { %902 = vmatprep.subr.bf16.mxu1 %v1000_v12  ;;  %857 = vmatmul.mubr.msk.f32.vlgmr.msra.gmra.mrb[0].mxu0 %vm29_vm1, %v17_v4  ;;  %v946_v13 = vpack.i.bf16 %v344_v7, %v340_v11 }
  0x7c   :  { %898 = vmatprep.subr.bf16.mxu0 %v1000_v12  ;;  %868 = vmatprep.mubr.msk.f32.mxu0 %vm993_vm0, %v992_v2  ;;  %v108_v14 = vpop.permute.xlu0 %107 }
  0x7d   :  { %862 = vmatmul.mubr.msk.f32.vlgmr.msra.gmra.mrb[0].mxu1 %vm29_vm1, %v108_v14  ;;  %947 = vrot.lane.b32.xlu0 %v946_v13, %s995_s20 }
  0x7e   :  { %877 = vmatprep.mubr.msk.f32.mxu1 %vm993_vm0, %v992_v2 }
  0x81   :  { %352 = vrot.lane.b32.xlu0 %v1101_v15, %s1001_s29 }
  0x85   :  { %349 = vperm.xlu0 %952, %v1116_v21  }
  0x89   :  { %954 = vset.pattern.permute.xlu0 %v1004_v42  ;;  %v1017_v42 = vmov 9  }
  0xe9   :  { %v347_v16 = vpop.permute.xlu1 %346 }
  0xea   :  { %359 = vrot.lane.b32.xlu1 %v347_v16, %s995_s20 }
  0xee   :  { %104 = vperm.xlu1 %951, %v1110_v17  }
  0xef   :  { %v948_v18 = vpop.permute.xlu0 %947 }
  0xf0   :  { %v950_v19 = vunpack.i.h.bf16 %v948_v18  ;;  %v949_v20 = vunpack.i.l.bf16 %v948_v18 }
  0xf2   :  { %v903_v22 = vpack.c.bf16 %v950_v19, %v949_v20  ;;  %953 = vset.pattern.permute.xlu1 %v1003_v36  ;;  %v831_v20 = vld [vmem:[%s1244_s3 + $0x4] ss:$0 sm:$0xff] }
  0xf3   :  { %v353_v26 = vpop.permute.xlu0 %352 }
  0xf4   :  { %904 = vmatpush3.bf16.msra.mxu1 %v903_v22  ;;  %v1009_v22 = vmov 0  }
  0xf5   :  { %875 = vmatprep.subr.mxu1 %v992_v2 }
 0x104   :  { %v350_v37 = vpop.permute.xlu0 %349 }
 0x150   :  { %v177_v24 = vpop.f32.mrb[0].mxu1 }
 0x151   :  { %v863_v25 = vpop.f32.mrb[1].mxu1 }
 0x15c   :  { %v360_v27 = vpop.permute.xlu1 %359 }
 0x15d   :  { %876 = vmatpush3.msra.mxu1 %v360_v27 }
 0x15e   :  { %878 = vmatmul.mubr.msk.f32.vlgmr.msra.gmra.mrb[2].mxu1 %vm364_vm2, %v353_v26  ;;  %908 = vmatprep.subr.bf16.mxu1 %v1000_v12 }
 0x15f   :  { %895 = vmatprep.mubr.msk.f32.mxu1 %vm993_vm0, %v992_v2 }
 0x16d   :  { %v105_v28 = vpop.permute.xlu1 %104 }
 0x16e   :  { %v178_v29 = vadd.f32 %v177_v24, %v105_v28 }
 0x170   :  { %v182_v30 = vsel %vm181_vm3, %v178_v29, 0.0 }
 0x171   :  { %183 = vadd.xlane.f32.xlu1 %v182_v30 }
 0x1fe   :  { %v184_v31 = vpop.xlane.xlu1 %183 }
 0x1ff   :  { %v185_v32 = vmul.f32 0.03125, %v184_v31 }
 0x201   :  { %v186_v33 = vsub.f32 %v178_v29, %v185_v32 }
 0x203   :  { %v187_v34 = vmul.f32 %v186_v33, %v186_v33 }
 0x205   :  { %v188_v35 = vsel %vm181_vm3, %v187_v34, 0.0  ;;  %v1159_v34 = vpop.f32.mrb[0].mxu0 }
 0x206   :  { %189 = vadd.xlane.f32.xlu1 %v188_v35  ;;  %v1011_v35 = vmov 4   ;;  %v858_v36 = vpop.f32.mrb[1].mxu0 }
 0x231   :  { %v433_v38 = vpop.f32.mrb[2].mxu1 }
 0x232   :  { %v434_v39 = vadd.f32 %v433_v38, %v350_v37  ;;  %v879_v40 = vpop.f32.mrb[3].mxu1 }
 0x233   :  { %v1171_v40 = vld [vmem:[%s1247_s2] sm:$0xf] }
 0x234   :  { %v437_v41 = vsel %vm181_vm3, %v434_v39, 0.0 }
 0x235   :  { %438 = vadd.xlane.f32.xlu0 %v437_v41  ;;  %v1016_v41 = vmov 8  }
 0x293   :  { %v190_v43 = vpop.xlane.xlu1 %189 }
 0x294   :  { %v191_v44 = vmul.f32 0.03125, %v190_v43 }
 0x296   :  { %v192_v45 = vadd.f32 1e-05, %v191_v44 }
 0x298   :  { %980 = vrsqrt.f32 %v192_v45 }
 0x2a2   :  { %v981_v46 = vpop.eup %980 }
 0x2a3   :  { %v194_v47 = vmul.f32 %v981_v46, %v1110_v17 }
 0x2a5   :  { %197 = vperm.xlu1 %953, %v194_v47  }
 0x2a9   :  { %955 = vset.pattern.permute.xlu1 %v1005_v53 }
 0x2c2   :  { %v439_v48 = vpop.xlane.xlu0 %438 }
 0x2c3   :  { %v440_v49 = vmul.f32 0.03125, %v439_v48 }
 0x2c5   :  { %v441_v50 = vsub.f32 %v434_v39, %v440_v49  ;;  %v469_v39 = vld [vmem:[%s1246_s1] sm:$0xf] }
 0x2c7   :  { %v442_v51 = vmul.f32 %v441_v50, %v441_v50 }
 0x2c9   :  { %v443_v52 = vsel %vm181_vm3, %v442_v51, 0.0 }
 0x2ca   :  { %444 = vadd.xlane.f32.xlu0 %v443_v52 }
 0x2e0   :  { %202 = vperm.xlu0 %954, %v1110_v17  }
 0x2e4   :  { %614 = vrot.lane.b32.xlu0 %v1060_v1, %s995_s20 }
 0x2e5   :  { %968 = vset.pattern.permute.xlu0 %v1011_v35 }
 0x324   :  { %v198_v58 = vpop.permute.xlu1 %197 }
 0x325   :  { %v200_v61 = vmul.f32 %v198_v58, %v186_v33 }
 0x357   :  { %v445_v54 = vpop.xlane.xlu0 %444 }
 0x358   :  { %v446_v55 = vmul.f32 0.03125, %v445_v54 }
 0x35a   :  { %v447_v56 = vadd.f32 1e-05, %v446_v55 }
 0x35c   :  { %982 = vrsqrt.f32 %v447_v56 }
 0x35f   :  { %v203_v60 = vpop.permute.xlu0 %202 }
 0x360   :  { %v205_v62 = vadd.f32 %v203_v60, %v200_v61 }
 0x362   :  { %v206_v4 = vmax.f32 %v205_v62, 0.0 }
 0x363   :  { %v615_v23 = vpop.permute.xlu0 %614 }
 0x366   :  { %v983_v57 = vpop.eup %982 }
 0x367   :  { %v449_v59 = vmul.f32 %v983_v57, %v1116_v21 }
 0x369   :  { %452 = vperm.xlu1 %955, %v449_v59  }
 0x36d   :  { %956 = vset.pattern.permute.xlu1 %v1006_v63 }
 0x36e   :  { %457 = vperm.xlu1 %956, %v1116_v21  }
 0x372   :  { %212 = vrot.lane.b32.xlu1 %v206_v4, %s1007_s8 }
 0x373   :  { %967 = vset.pattern.permute.xlu1 %v1009_v22 }
 0x376   :  { %494 = vrot.lane.b32.xlu1 %v1055_v0, %s994_s19 }
 0x3e8   :  { %v453_v5 = vpop.permute.xlu1 %452 }
 0x3e9   :  { %v455_v7 = vmul.f32 %v453_v5, %v441_v50 }
 0x3ed   :  { %v458_v8 = vpop.permute.xlu1 %457 }
 0x3ee   :  { %v460_v10 = vadd.f32 %v458_v8, %v455_v7 }
 0x3f0   :  { %v461_v11 = vmax.f32 %v460_v10, 0.0 }
 0x3f1   :  { %v213_v13 = vpop.permute.xlu1 %212 }
 0x3f2   :  { %216 = vst.msk [vmem:[#allocation2] sm:$0xf] %vm215_vm6, %v213_v13  ;;  %465 = vrot.lane.b32.xlu1 %v461_v11, %s1007_s8 }
 0x3f5   :  { %v495_v14 = vpop.permute.xlu1 %494 }
 0x3f6   :  { %v612_v16 = vmul.f32 %v495_v14, %v1060_v1 }
 0x3f8   :  { %617 = vrot.lane.b32.xlu0 %v612_v16, %s997_s23 }
 0x3f9   :  { %v219_v18 = vld [vmem:[#allocation2] sm:$0xf] }
 0x3fa   :  { %v241_v19 = vrot.slane %v219_v18, 4  ;;  %v239_v0 = vmul.f32 %v1084_v6, %v219_v18  ;;  %v229_v26 = vmul.f32 %v1089_v9, %v219_v18 }
 0x3fc   :  { %242 = vrot.lane.b32.xlu1 %v241_v19, %s995_s20  ;;  %256 = vrot.lane.b32.xlu0 %v1101_v15, %s1008_s9 }
 0x400   :  { %484 = vrot.lane.b32.xlu1 %v1072_v3, %s996_s0 }
 0x404   :  { %246 = vrot.lane.b32.xlu1 %v239_v0, %s997_s23 }
 0x408   :  { %504 = vrot.lane.b32.xlu1 %v831_v20, %s1010_s12 }
 0x40c   :  { %628 = vrot.lane.b32.xlu1 %v615_v23, %s995_s20 }
 0x464   :  { %v466_v24 = vpop.permute.xlu1 %465 }
 0x465   :  { %468 = vst.msk [vmem:[#allocation3] sm:$0xf] %vm215_vm6, %v466_v24 }
 0x46c   :  { %v471_v3 = vld [vmem:[#allocation3] sm:$0xf] }
 0x46d   :  { %v497_v33 = vmul.f32 %v495_v14, %v471_v3 }
 0x46e   :  { %v243_v15 = vpop.permute.xlu1 %242 }
 0x46f   :  { %v249_v29 = vsel %vm248_vm7, %v229_v26, %v243_v15  ;;  %v518_v37 = vrot.slane %v497_v33, 4  ;;  %v1020_v26 = vmov 14  }
 0x472   :  { %v485_v25 = vpop.permute.xlu1 %484 }
 0x473   :  { %v487_v6 = vmul.f32 %v485_v25, %v471_v3  ;;  %v611_v28 = vmul.f32 %v485_v25, %v1060_v1  ;;  %v618_v1 = vpop.permute.xlu0 %617 }
 0x475   :  { %v509_v27 = vrot.slane %v487_v6, 4  ;;  %v1019_v6 = vmov 10  }
 0x476   :  { %v247_v30 = vpop.permute.xlu1 %246 }
 0x477   :  { %v962_v31 = vpack.i.bf16 %v611_v28, %v509_v27  ;;  %v957_v32 = vpack.i.bf16 %v247_v30, %v249_v29  ;;  %v257_v43 = vpop.permute.xlu0 %256 }
 0x479   :  { %963 = vrot.lane.b32.xlu0 %v962_v31, %s995_s20  ;;  %958 = vrot.lane.b32.xlu1 %v957_v32, %s995_s20 }
 0x47a   :  { %v505_v9 = vpop.permute.xlu1 %504 }
 0x47b   :  { %v507_v38 = vmul.f32 %v505_v9, %v471_v3 }
 0x47d   :  { %519 = vrot.lane.b32.xlu0 %v518_v37, %s1012_s13  ;;  %514 = vrot.lane.b32.xlu1 %v471_v3, %s997_s23 }
 0x47e   :  { %v629_v44 = vpop.permute.xlu1 %628 }
 0x481   :  { %523 = vrot.lane.b32.xlu1 %v507_v38, %s1013_s14  ;;  %630 = vrot.lane.b32.xlu0 %v618_v1, %s995_s20 }
 0x485   :  { %533 = vrot.lane.b32.xlu1 %v469_v39, %s1014_s17  ;;  %623 = vrot.lane.b32.xlu0 %v469_v39, %s1015_s18 }
 0x489   :  { %22 = vperm.xlu1 %967, %v1110_v17   ;;  %252 = vperm.xlu0 %968, %v1116_v21   ;;  %v828_v17 = vld [vmem:[%s1244_s3] ss:$0 sm:$0xff] }
 0x48a   :  { %v477_v52 = vmul.f32 %v828_v17, %v471_v3  ;;  %v733_v17 = vld [vmem:[%s1247_s2] sm:$0xf] }
 0x48d   :  { %969 = vset.pattern.permute.xlu1 %v1016_v41  ;;  %971 = vset.pattern.permute.xlu0 %v1019_v6 }
 0x48e   :  { %529 = vperm.xlu1 %969, %v1171_v40  }
 0x492   :  { %970 = vset.pattern.permute.xlu1 %v1017_v42 }
 0x493   :  { %620 = vperm.xlu1 %970, %v1171_v40  }
 0x497   :  { %972 = vset.pattern.permute.xlu1 %v1020_v26 }
 0x4eb   :  { %v964_v45 = vpop.permute.xlu0 %963  ;;  %v959_v46 = vpop.permute.xlu1 %958 }
 0x4ec   :  { %v966_v21 = vunpack.i.h.bf16 %v964_v45  ;;  %v965_v47 = vunpack.i.l.bf16 %v964_v45  ;;  %v961_v48 = vunpack.i.h.bf16 %v959_v46  ;;  %v960_v49 = vunpack.i.l.bf16 %v959_v46 }
 0x4ed   :  { %v1021_v46 = vmov 15  }
 0x4ee   :  { %v909_v50 = vpack.c.bf16 %v629_v44, %v966_v21  ;;  %v899_v51 = vpack.c.bf16 %v961_v48, %v960_v49  ;;  %v525_v55 = vsel %vm248_vm7, %v477_v52, %v965_v47  ;;  %v1022_v21 = vmov 13   ;;  %v761_v47 = vld [vmem:[%s1247_s2] sm:$0xf] }
 0x4ef   :  { %v520_v53 = vpop.permute.xlu0 %519  ;;  %v515_v54 = vpop.permute.xlu1 %514  ;;  %v1023_v48 = vmov 16   ;;  %v1024_v49 = vmov 17  }
 0x4f0   :  { %v526_v56 = vsel %vm248_vm7, %v515_v54, %v520_v53  ;;  %901 = vmatpush3.bf16.msk.msra.mxu0 %vm900_vm9, %v899_v51  ;;  %910 = vmatpush3.bf16.msra.mxu1 %v909_v50 }
 0x4f1   :  { %v906_v57 = vpack.c.bf16 %v526_v56, %v525_v55  ;;  %905 = vmatprep.subr.bf16.mxu0 %v1000_v12  ;;  %893 = vmatprep.subr.mxu1 %v992_v2 }
 0x4f3   :  { %v524_v58 = vpop.permute.xlu1 %523  ;;  %869 = vmatmul.mubr.msk.f32.vlgmr.msra.gmra.mrb[2].mxu0 %vm264_vm10, %v257_v43  ;;  %v631_v59 = vpop.permute.xlu0 %630 }
 0x4f4   :  { %907 = vmatpush3.bf16.msra.mxu0 %v906_v57  ;;  %886 = vmatprep.mubr.msk.f32.mxu0 %vm993_vm0, %v992_v2 }
 0x4f5   :  { %884 = vmatprep.subr.mxu0 %v992_v2  ;;  %894 = vmatpush3.msra.mxu1 %v631_v59 }
 0x4f7   :  { %v534_v60 = vpop.permute.xlu1 %533  ;;  %v624_v61 = vpop.permute.xlu0 %623 }
 0x4f8   :  { %885 = vmatpush3.msk.msra.mxu0 %vm248_vm7, %v524_v58  ;;  %896 = vmatmul.mubr.msk.f32.vlgmr.msra.gmra.mrb[4].mxu1 %vm364_vm2, %v624_v61 }
 0x4f9   :  { %887 = vmatmul.mubr.msk.f32.vlgmr.msra.gmra.mrb[4].mxu0 %vm535_vm11, %v534_v60 }
 0x508   :  { %v23_v12 = vpop.permute.xlu1 %22  ;;  %v253_v4 = vpop.permute.xlu0 %252 }
 0x509   :  { %v100_v62 = vadd.f32 %v1159_v34, %v23_v12 }
 0x50b   :  { %v707_v63 = vsel %vm181_vm3, %v100_v62, 0.0 }
 0x50c   :  { %708 = vadd.xlane.f32.xlu0 %v707_v63 }
 0x50d   :  { %v530_v8 = vpop.permute.xlu1 %529 }
 0x512   :  { %v621_v18 = vpop.permute.xlu1 %620 }
 0x599   :  { %v709_v5 = vpop.xlane.xlu0 %708 }
 0x59a   :  { %v710_v7 = vmul.f32 0.03125, %v709_v5 }
 0x59c   :  { %v1190_v2 = vsub.f32 %v100_v62, %v710_v7  ;;  %v789_v62 = vld [vmem:[%s1247_s2] sm:$0xf] }
 0x59e   :  { %v712_v16 = vmul.f32 %v1190_v2, %v1190_v2 }
 0x5a0   :  { %v713_v24 = vsel %vm181_vm3, %v712_v16, 0.0 }
 0x5c6   :  { %v335_v10 = vpop.f32.mrb[2].mxu0 }
 0x5c7   :  { %v336_v11 = vadd.f32 %v335_v10, %v253_v4  ;;  %v870_v13 = vpop.f32.mrb[3].mxu0 }
 0x5c9   :  { %v734_v14 = vsel %vm181_vm3, %v336_v11, 0.0 }
 0x5ca   :  { %735 = vadd.xlane.f32.xlu1 %v734_v14 }
 0x5cb   :  { %v703_v19 = vpop.f32.mrb[4].mxu1 }
 0x5cc   :  { %v606_v0 = vpop.f32.mrb[4].mxu0  ;;  %v897_v20 = vpop.f32.mrb[5].mxu1  ;;  %v704_v15 = vadd.f32 %v703_v19, %v621_v18 }
 0x5cd   :  { %v607_v22 = vadd.f32 %v606_v0, %v530_v8  ;;  %v888_v23 = vpop.f32.mrb[5].mxu0  ;;  %v1025_v8 = vmov 11  }
 0x5ce   :  { %714 = vadd.xlane.f32.xlu1 %v713_v24  ;;  %v790_v25 = vsel %vm181_vm3, %v704_v15, 0.0 }
 0x5cf   :  { %v762_v3 = vsel %vm181_vm3, %v607_v22, 0.0 }
 0x5d0   :  { %763 = vadd.xlane.f32.xlu0 %v762_v3 }
 0x5d4   :  { %791 = vadd.xlane.f32.xlu0 %v790_v25 }
 0x657   :  { %v736_v27 = vpop.xlane.xlu1 %735 }
 0x658   :  { %v737_v28 = vmul.f32 0.03125, %v736_v27 }
 0x65a   :  { %v1198_v29 = vsub.f32 %v336_v11, %v737_v28  ;;  %v1026_v11 = vmov 12  }
 0x65b   :  { %v715_v30 = vpop.xlane.xlu1 %714 }
 0x65c   :  { %v716_v31 = vmul.f32 0.03125, %v715_v30  ;;  %v739_v32 = vmul.f32 %v1198_v29, %v1198_v29 }
 0x65d   :  { %v764_v33 = vpop.xlane.xlu0 %763 }
 0x65e   :  { %v717_v34 = vadd.f32 1e-05, %v716_v31  ;;  %v765_v35 = vmul.f32 0.03125, %v764_v33  ;;  %v740_v36 = vsel %vm181_vm3, %v739_v32, 0.0 }
 0x65f   :  { %741 = vadd.xlane.f32.xlu1 %v740_v36 }
 0x660   :  { %984 = vrsqrt.f32 %v717_v34  ;;  %v1203_v37 = vsub.f32 %v607_v22, %v765_v35 }
 0x661   :  { %v792_v9 = vpop.xlane.xlu0 %791 }
 0x662   :  { %v793_v1 = vmul.f32 0.03125, %v792_v9  ;;  %v767_v38 = vmul.f32 %v1203_v37, %v1203_v37 }
 0x664   :  { %v1207_v39 = vsub.f32 %v704_v15, %v793_v1  ;;  %v768_v41 = vsel %vm181_vm3, %v767_v38, 0.0 }
 0x665   :  { %769 = vadd.xlane.f32.xlu1 %v768_v41 }
 0x666   :  { %v795_v42 = vmul.f32 %v1207_v39, %v1207_v39 }
 0x668   :  { %v796_v43 = vsel %vm181_vm3, %v795_v42, 0.0 }
 0x669   :  { %797 = vadd.xlane.f32.xlu1 %v796_v43 }
 0x66a   :  { %v985_v44 = vpop.eup %984 }
 0x66b   :  { %v719_v45 = vmul.f32 %v985_v44, %v1171_v40 }
 0x66d   :  { %722 = vperm.xlu0 %971, %v719_v45  }
 0x671   :  { %974 = vset.pattern.permute.xlu0 %v1023_v48 }
 0x672   :  { %783 = vperm.xlu0 %974, %v761_v47  }
 0x676   :  { %979 = vset.pattern.permute.xlu0 %v1024_v49 }
 0x67a   :  { %727 = vperm.xlu1 %972, %v1171_v40  }
 0x67e   :  { %973 = vset.pattern.permute.xlu1 %v1021_v46 }
 0x67f   :  { %755 = vperm.xlu1 %973, %v733_v17  }
 0x683   :  { %975 = vset.pattern.permute.xlu1 %v1022_v21 }
 0x6ec   :  { %v742_v50 = vpop.xlane.xlu1 %741  ;;  %v723_v52 = vpop.permute.xlu0 %722 }
 0x6ed   :  { %v743_v51 = vmul.f32 0.03125, %v742_v50  ;;  %v725_v55 = vmul.f32 %v723_v52, %v1190_v2 }
 0x6ef   :  { %v744_v57 = vadd.f32 1e-05, %v743_v51 }
 0x6f1   :  { %v784_v22 = vpop.permute.xlu0 %783 }
 0x6f2   :  { %v770_v40 = vpop.xlane.xlu1 %769 }
 0x6f3   :  { %v771_v59 = vmul.f32 0.03125, %v770_v40 }
 0x6f5   :  { %v772_v12 = vadd.f32 1e-05, %v771_v59 }
 0x6f6   :  { %v798_v53 = vpop.xlane.xlu1 %797 }
 0x6f7   :  { %v799_v54 = vmul.f32 0.03125, %v798_v53 }
 0x6f9   :  { %v800_v56 = vadd.f32 1e-05, %v799_v54 }
 0x6fa   :  { %v728_v58 = vpop.permute.xlu1 %727 }
 0x6fb   :  { %986 = vrsqrt.f32 %v800_v56  ;;  %v730_v60 = vadd.f32 %v728_v58, %v725_v55 }
 0x6fc   :  { %988 = vrsqrt.f32 %v744_v57 }
 0x6fd   :  { %v731_v61 = vmax.f32 %v730_v60, 0.0  ;;  %990 = vrsqrt.f32 %v772_v12 }
 0x6fe   :  { %v756_v13 = vpop.permute.xlu1 %755 }
 0x6ff   :  { %732 = vst.msk [vmem:[%s1248_s4] sm:$0xf] %vm181_vm3, %v731_v61 }
 0x705   :  { %v987_v63 = vpop.eup %986 }
 0x706   :  { %v802_v4 = vmul.f32 %v987_v63, %v789_v62  ;;  %v989_v5 = vpop.eup %988 }
 0x707   :  { %v746_v7 = vmul.f32 %v989_v5, %v733_v17  ;;  %v991_v2 = vpop.eup %990 }
 0x708   :  { %805 = vperm.xlu1 %975, %v802_v4   ;;  %v774_v10 = vmul.f32 %v991_v2, %v761_v47 }
 0x70c   :  { %976 = vset.pattern.permute.xlu1 %v1025_v8 }
 0x70d   :  { %749 = vperm.xlu1 %976, %v746_v7  }
 0x711   :  { %977 = vset.pattern.permute.xlu1 %v1026_v11 }
 0x712   :  { %777 = vperm.xlu1 %977, %v774_v10  }
 0x716   :  { %978 = vset.pattern.permute.xlu1 %v1024_v49 }
 0x717   :  { %811 = vperm.xlu1 %978, %v789_v62  }
 0x787   :  { %v806_v14 = vpop.permute.xlu1 %805 }
 0x788   :  { %v808_v15 = vmul.f32 %v806_v14, %v1207_v39 }
 0x78c   :  { %v750_v16 = vpop.permute.xlu1 %749 }
 0x78d   :  { %v752_v18 = vmul.f32 %v750_v16, %v1198_v29 }
 0x78f   :  { %v758_v19 = vadd.f32 %v756_v13, %v752_v18 }
 0x791   :  { %v759_v0 = vmax.f32 %v758_v19, 0.0  ;;  %v778_v20 = vpop.permute.xlu1 %777 }
 0x792   :  { %v780_v23 = vmul.f32 %v778_v20, %v1203_v37 }
 0x793   :  { %760 = vst.msk [vmem:[%s1248_s4 + $0x4] sm:$0xf] %vm181_vm3, %v759_v0 }
 0x794   :  { %v786_v24 = vadd.f32 %v784_v22, %v780_v23 }
 0x796   :  { %v787_v3 = vmax.f32 %v786_v24, 0.0  ;;  %v812_v25 = vpop.permute.xlu1 %811 }
 0x797   :  { %v814_v6 = vadd.f32 %v812_v25, %v808_v15 }
 0x798   :  { %788 = vst.msk [vmem:[%s1248_s4 + $0x8] sm:$0xf] %vm181_vm3, %v787_v3 }
 0x799   :  { %v815_v26 = vmax.f32 %v814_v6, 0.0 }
 0x79b   :  { %816 = vst.msk [vmem:[%s1248_s4 + $0xc] sm:$0xf] %vm181_vm3, %v815_v26 }

</bundles_post_ra>
